<compile_context>
chip_gen: v5e
topology: v5e:2x2
jax: 0.10.0
libtpu: 0.0.40
codegen_flags: <defaults>
</compile_context>

<pallas_src>
import jax
import jax.numpy as jnp
from jax.experimental import pallas as pl
from jax.experimental.pallas import tpu as pltpu


def channel_att_kernel(w1s_ref, bb_ref, w2t_ref, b2_ref, im_ref, cv_ref, out_ref):
    # 1x1 convs == per-pixel matmuls, weights on the left so the attention is
    # (Ccv, tile_hw): lane-dense and broadcastable over D with no reshuffle.
    im = im_ref[...]                                                      # (Cim,  T)
    h = jnp.dot(w1s_ref[...], im, preferred_element_type=jnp.float32)     # (Cmid, T)  BN scale pre-folded
    h = h + bb_ref[...]                                                   # folded eval-BN bias
    h = jnp.where(h > 0, h, 0.01 * h)                                     # LeakyReLU(0.01) (PyTorch default)
    att = jnp.dot(w2t_ref[...], h, preferred_element_type=jnp.float32) + b2_ref[...]
    att = jax.nn.sigmoid(att)                                             # (Ccv, T)  (EUP; hidden under DMA)
    # Gate the cost volume; broadcast attention over the disparity (sublane) dim.
    out_ref[...] = (cv_ref[...] * att[:, None, :]).astype(out_ref.dtype)


def _choose_tile_hw(HW, Cim, Cmid, Ccv, D, itemsize, B,
                    target_cv_block_bytes=6 << 20,
                    vmem_budget_bytes=40 << 20,
                    min_grid_steps=8,
                    min_tile=512):
    """Pick the H*W tile (multiple of 128, or the full extent if HW <= 128)."""
    if HW <= 128:
        return HW                                   # full-extent last dim is always legal
    # Live VMEM bytes per H*W column:
    #   2x double-buffered cv in + 2x cv out + 2x im in + h/att f32 intermediates.
    per_col_vmem = (4 * Ccv * D + 2 * Cim) * itemsize + (Cmid + Ccv) * 4
    per_col_cv = max(1, Ccv * D * itemsize)
    t_budget = min(vmem_budget_bytes // per_col_vmem,
                   target_cv_block_bytes // per_col_cv)
    # Keep enough grid steps for v7x's two TensorCores (heuristic), but never
    # shrink below ~min_tile lanes (per-grid-step overhead would dominate).
    steps_per_batch = max(1, -(-min_grid_steps // max(1, B)))   # ceil(8 / B)
    t_steps = max(HW // steps_per_batch, min(min_tile, HW))
    t = min(int(t_budget), int(t_steps), int(HW))
    t = max(128, (t // 128) * 128)
    return t


def channel_att_pallas(cv_ncdhw, im_nchw, params):
    """cv_ncdhw: (B, Ccv, D, H, W); im_nchw: (B, Cim, Him, Wim)."""
    w1, bn_scale, bn_bias, w2, b2 = params
    B, Ccv, D, H, W = cv_ncdhw.shape

    # Match PyTorch F.interpolate(mode='bilinear', align_corners=False): no antialias.
    if im_nchw.shape[-2:] != (H, W):
        im_nchw = jax.image.resize(
            im_nchw, im_nchw.shape[:2] + (H, W), method="bilinear", antialias=False)

    Cim = im_nchw.shape[1]
    Cmid = w1.shape[1]
    HW = H * W

    # Native layouts: pure (free) reshapes, no HBM transposes or pads of cv/im.
    im_flat = im_nchw.reshape(B, Cim, HW)                 # (B, Cim, HW)
    cv_flat = cv_ncdhw.reshape(B, Ccv, D, HW)             # (B, Ccv, D, HW)

    itemsize = jnp.dtype(cv_flat.dtype).itemsize
    tile_hw = _choose_tile_hw(HW, Cim, Cmid, Ccv, D, itemsize, B)
    n_hw = pl.cdiv(HW, tile_hw)                           # ragged tail handled by Pallas masking

    # Weights-on-the-left orientation; fold the eval-BN scale into w1 (free).
    w1s = jnp.transpose(w1) * bn_scale.reshape(Cmid, 1)   # (Cmid, Cim)
    w2t = jnp.transpose(w2)                               # (Ccv, Cmid)
    bb_col = bn_bias.reshape(Cmid, 1)
    b2_col = b2.reshape(Ccv, 1)

    # Explicit VMEM limit sized from the actual requirement; 48 MiB cap keeps
    # headroom on v7x (64 MiB physical) and is trivially safe on v5e/v6e.
    per_col_vmem = (4 * Ccv * D + 2 * Cim) * itemsize + (Cmid + Ccv) * 4
    weights_bytes = 2 * 4 * (Cmid * Cim + Cmid + Ccv * Cmid + Ccv)
    vmem_needed = tile_hw * per_col_vmem + weights_bytes
    vmem_limit = int(min(max(int(vmem_needed * 1.3) + (4 << 20), 32 << 20), 48 << 20))

    grid = (B, n_hw)                                      # both axes independent

    # TODO(synk): if the caller no longer needs the un-gated cost volume, add
    # input_output_aliases={6: 0} to donate cv's HBM buffer to the output.
    out_flat = pl.pallas_call(
        channel_att_kernel,
        out_shape=jax.ShapeDtypeStruct((B, Ccv, D, HW), cv_flat.dtype),
        grid_spec=pltpu.PrefetchScalarGridSpec(
            num_scalar_prefetch=0,
            grid=grid,
            in_specs=[
                pl.BlockSpec((Cmid, Cim), lambda b, i: (0, 0)),              # w1^T * bn_scale
                pl.BlockSpec((Cmid, 1), lambda b, i: (0, 0)),                # BN bias
                pl.BlockSpec((Ccv, Cmid), lambda b, i: (0, 0)),              # w2^T
                pl.BlockSpec((Ccv, 1), lambda b, i: (0, 0)),                 # conv2 bias
                pl.BlockSpec((None, Cim, tile_hw), lambda b, i: (b, 0, i)),  # im pixels
                pl.BlockSpec((None, Ccv, D, tile_hw),
                             lambda b, i: (b, 0, 0, i)),                     # cost volume
            ],
            out_specs=pl.BlockSpec((None, Ccv, D, tile_hw),
                                   lambda b, i: (b, 0, 0, i)),
        ),
        compiler_params=pltpu.CompilerParams(
            dimension_semantics=("parallel", "parallel"),
            vmem_limit_bytes=vmem_limit),
    )(w1s, bb_col, w2t, b2_col, im_flat, cv_flat)

    return out_flat.reshape(B, Ccv, D, H, W)


def make_params(key, im_chan, cv_chan):
    mid_chan = max(1, im_chan // 2)
    k1, k2, k3, k4, k5, k6 = jax.random.split(key, 6)
    # conv1: 1x1, no bias -> matrix (Cim, Cmid)
    w1 = 0.1 * jax.random.normal(k1, (im_chan, mid_chan), jnp.float32)
    # BatchNorm2d (eval): gamma, beta, running stats folded into scale/bias.
    gamma = 1.0 + 0.1 * jax.random.normal(k2, (mid_chan,), jnp.float32)
    beta = 0.1 * jax.random.normal(k3, (mid_chan,), jnp.float32)
    rmean = 0.05 * jax.random.normal(k4, (mid_chan,), jnp.float32)
    rvar = jnp.abs(1.0 + 0.1 * jax.random.normal(k5, (mid_chan,), jnp.float32))
    eps = 1e-5
    inv_std = 1.0 / jnp.sqrt(rvar + eps)
    bn_scale = gamma * inv_std
    bn_bias = beta - rmean * gamma * inv_std
    # conv2: 1x1, with bias -> matrix (Cmid, Ccv), bias (Ccv,)
    w2 = 0.1 * jax.random.normal(k6, (mid_chan, cv_chan), jnp.float32)
    b2 = 0.01 * jnp.arange(cv_chan, dtype=jnp.float32)
    return (w1, bn_scale, bn_bias, w2, b2)


def reference_jax(cv, im, params):
    """Pure-JAX reference mirroring the PyTorch forward (eval-mode BN)."""
    w1, bn_scale, bn_bias, w2, b2 = params
    B, Ccv, D, H, W = cv.shape
    if im.shape[-2:] != (H, W):
        im = jax.image.resize(im, im.shape[:2] + (H, W),
                              method="bilinear", antialias=False)
    x = jnp.einsum("bchw,cm->bmhw", im, w1)
    x = x * bn_scale[None, :, None, None] + bn_bias[None, :, None, None]
    x = jnp.where(x > 0, x, 0.01 * x)
    att = jnp.einsum("bmhw,mc->bchw", x, w2) + b2[None, :, None, None]
    att = jax.nn.sigmoid(att)
    return att[:, :, None, :, :] * cv


if __name__ == "__main__":
    # Small shapes: batch=2, im_chan=8, cv_chan=4, disparity D=8, spatial 16x16.
    B, im_chan, cv_chan, D, H, W = 2, 8, 4, 8, 16, 16

    key = jax.random.PRNGKey(0)
    k_cv, k_im, k_p = jax.random.split(key, 3)
    cv = jax.random.normal(k_cv, (B, cv_chan, D, H, W), jnp.float32)
    im = jax.random.normal(k_im, (B, im_chan, H, W), jnp.float32)
    params = make_params(k_p, im_chan, cv_chan)

    out = channel_att_pallas(cv, im, params)
    out = jax.block_until_ready(out)

    ref = reference_jax(cv, im, params)
    assert out.shape == cv.shape
    assert jnp.allclose(out, ref, atol=1e-4, rtol=1e-4), "mismatch vs pure-JAX reference"

    print("KERNEL_OK")
</pallas_src>

<mosaic_0001>
module attributes {stable_mosaic.version = 11 : i64} {
  func.func @channel_att_kernel(%arg0: i32, %arg1: i32, %arg2: memref<4x8xf32, #tpu.memory_space<vmem>>, %arg3: memref<4x1xf32, #tpu.memory_space<vmem>>, %arg4: memref<4x4xf32, #tpu.memory_space<vmem>>, %arg5: memref<4x1xf32, #tpu.memory_space<vmem>>, %arg6: memref<1x8x256xf32, #tpu.memory_space<vmem>>, %arg7: memref<1x4x8x256xf32, #tpu.memory_space<vmem>>, %arg8: memref<1x4x8x256xf32, #tpu.memory_space<vmem>>) attributes {dimension_semantics = [#tpu.dimension_semantics<parallel>, #tpu.dimension_semantics<parallel>], iteration_bounds = array<i64: 2, 1>, scalar_prefetch = 0 : i64, scratch_operands = 0 : i64, tpu.core_type = #tpu.core_type<tc>, window_params = [{pipeline_mode = #tpu.pipeline_mode<synchronous>, transform_indices = @transform_0, window_bounds = array<i64: 4, 8>}, {pipeline_mode = #tpu.pipeline_mode<synchronous>, transform_indices = @transform_1, window_bounds = array<i64: 4, 1>}, {pipeline_mode = #tpu.pipeline_mode<synchronous>, transform_indices = @transform_2, window_bounds = array<i64: 4, 4>}, {pipeline_mode = #tpu.pipeline_mode<synchronous>, transform_indices = @transform_3, window_bounds = array<i64: 4, 1>}, {transform_indices = @transform_4, window_bounds = array<i64: 1, 8, 256>}, {transform_indices = @transform_5, window_bounds = array<i64: 1, 4, 8, 256>}, {transform_indices = @transform_6, window_bounds = array<i64: 1, 4, 8, 256>}]} {
    %c0 = arith.constant 0 : index
    %c0_0 = arith.constant 0 : index
    %c0_1 = arith.constant 0 : index
    %0 = vector.load %arg6[%c0, %c0_0, %c0_1] : memref<1x8x256xf32, #tpu.memory_space<vmem>>, vector<1x8x256xf32>
    %1 = vector.shape_cast %0 : vector<1x8x256xf32> to vector<8x256xf32>
    %c0_2 = arith.constant 0 : index
    %c0_3 = arith.constant 0 : index
    %2 = vector.load %arg2[%c0_2, %c0_3] : memref<4x8xf32, #tpu.memory_space<vmem>>, vector<4x8xf32>
    %cst = arith.constant dense<0.000000e+00> : vector<4x256xf32>
    %3 = tpu.matmul %2, %1, %cst {dimension_numbers = #tpu.dot_dimension_numbers<[1], [0], [0], [1], [0, 0, 1, 1], [], []>} : vector<4x8xf32>, vector<8x256xf32>, vector<4x256xf32> -> vector<4x256xf32>
    %c0_4 = arith.constant 0 : index
    %c0_5 = arith.constant 0 : index
    %4 = vector.load %arg3[%c0_4, %c0_5] : memref<4x1xf32, #tpu.memory_space<vmem>>, vector<4x1xf32>
    %5 = vector.broadcast %4 : vector<4x1xf32> to vector<4x256xf32>
    %6 = arith.addf %3, %5 : vector<4x256xf32>
    %cst_6 = arith.constant 0.000000e+00 : f32
    %7 = vector.broadcast %cst_6 : f32 to vector<4x256xf32>
    %8 = arith.cmpf ogt, %6, %7 : vector<4x256xf32>
    %cst_7 = arith.constant 0.00999999977 : f32
    %9 = vector.broadcast %cst_7 : f32 to vector<4x256xf32>
    %10 = arith.mulf %9, %6 : vector<4x256xf32>
    %11 = arith.select %8, %6, %10 : vector<4x256xi1>, vector<4x256xf32>
    %c0_8 = arith.constant 0 : index
    %c0_9 = arith.constant 0 : index
    %12 = vector.load %arg4[%c0_8, %c0_9] : memref<4x4xf32, #tpu.memory_space<vmem>>, vector<4x4xf32>
    %cst_10 = arith.constant dense<0.000000e+00> : vector<4x256xf32>
    %13 = tpu.matmul %12, %11, %cst_10 {dimension_numbers = #tpu.dot_dimension_numbers<[1], [0], [0], [1], [0, 0, 1, 1], [], []>} : vector<4x4xf32>, vector<4x256xf32>, vector<4x256xf32> -> vector<4x256xf32>
    %c0_11 = arith.constant 0 : index
    %c0_12 = arith.constant 0 : index
    %14 = vector.load %arg5[%c0_11, %c0_12] : memref<4x1xf32, #tpu.memory_space<vmem>>, vector<4x1xf32>
    %15 = vector.broadcast %14 : vector<4x1xf32> to vector<4x256xf32>
    %16 = arith.addf %13, %15 : vector<4x256xf32>
    %17 = arith.negf %16 : vector<4x256xf32>
    %18 = math.exp %17 : vector<4x256xf32>
    %cst_13 = arith.constant 1.000000e+00 : f32
    %19 = vector.broadcast %cst_13 : f32 to vector<4x256xf32>
    %20 = arith.addf %19, %18 : vector<4x256xf32>
    %21 = arith.divf %19, %20 : vector<4x256xf32>
    %c0_14 = arith.constant 0 : index
    %c0_15 = arith.constant 0 : index
    %c0_16 = arith.constant 0 : index
    %c0_17 = arith.constant 0 : index
    %22 = vector.load %arg7[%c0_14, %c0_15, %c0_16, %c0_17] : memref<1x4x8x256xf32, #tpu.memory_space<vmem>>, vector<1x4x8x256xf32>
    %23 = vector.shape_cast %22 : vector<1x4x8x256xf32> to vector<4x8x256xf32>
    %24 = vector.shape_cast %21 : vector<4x256xf32> to vector<4x1x256xf32>
    %25 = vector.broadcast %24 : vector<4x1x256xf32> to vector<4x8x256xf32>
    %26 = arith.mulf %23, %25 : vector<4x8x256xf32>
    %c0_18 = arith.constant 0 : index
    %c0_19 = arith.constant 0 : index
    %c0_20 = arith.constant 0 : index
    %c0_21 = arith.constant 0 : index
    %27 = vector.load %arg8[%c0_18, %c0_19, %c0_20, %c0_21] : memref<1x4x8x256xf32, #tpu.memory_space<vmem>>, vector<1x4x8x256xf32>
    %28 = vector.shape_cast %27 : vector<1x4x8x256xf32> to vector<4x8x256xf32>
    %29 = vector.shape_cast %26 : vector<4x8x256xf32> to vector<1x4x8x256xf32>
    tpu.vector_store %arg8[%c0_18, %c0_19, %c0_20, %c0_21], %29 {strides = array<i32>} : memref<1x4x8x256xf32, #tpu.memory_space<vmem>>, vector<1x4x8x256xf32>,
    return
  }
  func.func @transform_0(%arg0: i32, %arg1: i32) -> (i32, i32) {
    %c0_i32 = arith.constant 0 : i32
    %c0_i32_0 = arith.constant 0 : i32
    %c0_i32_1 = arith.constant 0 : i32
    return %c0_i32, %c0_i32_0 : i32, i32
  }
  func.func @transform_1(%arg0: i32, %arg1: i32) -> (i32, i32) {
    %c0_i32 = arith.constant 0 : i32
    %c0_i32_0 = arith.constant 0 : i32
    %c0_i32_1 = arith.constant 0 : i32
    return %c0_i32, %c0_i32_0 : i32, i32
  }
  func.func @transform_2(%arg0: i32, %arg1: i32) -> (i32, i32) {
    %c0_i32 = arith.constant 0 : i32
    %c0_i32_0 = arith.constant 0 : i32
    %c0_i32_1 = arith.constant 0 : i32
    return %c0_i32, %c0_i32_0 : i32, i32
  }
  func.func @transform_3(%arg0: i32, %arg1: i32) -> (i32, i32) {
    %c0_i32 = arith.constant 0 : i32
    %c0_i32_0 = arith.constant 0 : i32
    %c0_i32_1 = arith.constant 0 : i32
    return %c0_i32, %c0_i32_0 : i32, i32
  }
  func.func @transform_4(%arg0: i32, %arg1: i32) -> (i32, i32, i32) {
    %c0_i32 = arith.constant 0 : i32
    %c0_i32_0 = arith.constant 0 : i32
    return %arg0, %c0_i32, %arg1 : i32, i32, i32
  }
  func.func @transform_5(%arg0: i32, %arg1: i32) -> (i32, i32, i32, i32) {
    %c0_i32 = arith.constant 0 : i32
    %c0_i32_0 = arith.constant 0 : i32
    %c0_i32_1 = arith.constant 0 : i32
    return %arg0, %c0_i32, %c0_i32_0, %arg1 : i32, i32, i32, i32
  }
  func.func @transform_6(%arg0: i32, %arg1: i32) -> (i32, i32, i32, i32) {
    %c0_i32 = arith.constant 0 : i32
    %c0_i32_0 = arith.constant 0 : i32
    %c0_i32_1 = arith.constant 0 : i32
    return %arg0, %c0_i32, %c0_i32_0, %arg1 : i32, i32, i32, i32
  }
}

</mosaic_0001>

<bundles_post_ra>
// kernel: tpu_custom_call.1
= control target key start
LH: loop header
LB: loop body
LE: loop exit
PB: predicated region body
PF: predicated region fallthrough
CT: control target
= control target key end

     0   :  { %s1152_s0 = inlined_call_operand.vmem [shape: f32[4,8], index: 0, kind: input, shape index: {}]   ;;  %s1153_s1 = inlined_call_operand.vmem [shape: f32[4,1], index: 1, kind: input, shape index: {}]   ;;  %s1154_s2 = inlined_call_operand.vmem [shape: f32[4,4], index: 2, kind: input, shape index: {}]   ;;  %s1155_s3 = inlined_call_operand.vmem [shape: f32[4,1], index: 3, kind: input, shape index: {}]   ;;  %s1156_s4 = inlined_call_operand.hbm [shape: f32[2,8,256], index: 4, kind: input, shape index: {}]   ;;  %s1157_s5 = inlined_call_operand.hbm [shape: f32[2,4,8,256], index: 5, kind: input, shape index: {}]   ;;  %s1158_s6 = inlined_call_operand.hbm [shape: f32[2,4,8,256], index: 6, kind: output, shape index: {}]  }
   0x1   :  { %1160 = sst [smem:[#allocation13_spill]] %s1156_s4 }
   0x2   :  { %11 = vsyncpa [#allocation3], 0 }
   0x3   :  { %13 = vsyncpa [#allocation3 + $0x1], 0 }
   0x4   :  { %14 = vsyncpa [#allocation6], 0 }
   0x5   :  { %16 = vsyncpa [#allocation6 + $0x1], 0 }
   0x6   :  { %17 = vsyncpa [#allocation4], 0 }
   0x7   :  { %19 = vsyncpa [#allocation4 + $0x1], 0  ;;  %s976_s21 = smov 0   ;;  %s978_s22 = smov 0  }
   0x8   :  { %s980_s23 = smov 0   ;;  %s982_s24 = smov 0  }
   0x9   :  { %s984_s25 = smov 0   ;;  %s986_s26 = smov 0  }
   0xa LB: > { %s677_s27 = sadd.s32 4294967295, %s934_s26   ;;  %s678_s28 = sadd.s32 4294967294, %s934_s26   ;;  %s934_s26 = sphi %s986_s26, %s25_s26   ;;  %s930_s25 = sphi %s984_s25, %s1177_s25   ;;  %s926_s24 = sphi %s982_s24, %s1176_s24   ;;  %s922_s23 = sphi %s980_s23, %s1175_s23   ;;  %s918_s22 = sphi %s978_s22, %s1174_s22   ;;  %s914_s21 = sphi %s976_s21, %s1173_s21  }
   0xb   : > { %s37_s29 = sadd.s32 1, %s930_s25  ;;  %s130_s30 = sadd.s32 1, %s922_s23 }
   0xc   : > { %p39_p0 = scmp.ge.s32.totalorder %s37_s29, 2  ;;  %p137_p1 = scmp.ne.s32.totalorder %s922_s23, %s918_s22 }
   0xd   : > { %p138_p2 = scmp.eq.s32.totalorder %s934_s26, 0  ;;  %p143_p3 = scmp.ne.s32.totalorder %s918_s22, %s914_s21 }
   0xe   : > { %s1179_s29 = smov (%p39_p0, %s37_s29), 0  ;;  %p144_p5 = scmp.eq.s32.totalorder %s677_s27, 0 }
   0xf   : > { %1161 = sst [smem:[#allocation11_spill]] %s1179_s29  ;;  %p1017_p4 = por %p138_p2, %p137_p1 }
  0x10   : > { %s125_s8 = ssub.s32 %s930_s25, %s1179_s29  ;;  %p197_p6 = scmp.eq.s32.totalorder %s677_s27, 1 }
  0x11   : > { %p128_p7 = scmp.eq.s32.totalorder %s125_s8, 0  ;;  %p1023_p8 = por %p144_p5, %p143_p3 }
  0x12   : > { %p1027_p9 = por %p197_p6, %p137_p1  ;;  %p203_p10 = scmp.eq.s32.totalorder %s678_s28, 1 }
  0x13   : > { %s1032_s11 = scalar_select %p128_p7, %s922_s23, %s130_s30  }
  0x14   : > { %p1034_p11 = por %p203_p10, %p143_p3  ;;  %p680_p12 = scmp.ge.s32.totalorder %s934_s26, 2 }
  0x15   : > { %1165 = sst [smem:[#allocation12_spill]] %s1032_s11  ;;  %p724_p13 = scmp.lt.s32.totalorder %s934_s26, 2 }
  0x16   : > { %s1041_s13 = sand.u32 1, %s922_s23   ;;  %s704_s15 = sshll.u32 %s930_s25, 4 }
  0x17   : > { %s681_s14 = sshll.u32 %s1041_s13, 4  ;;  %s1167_s4 = sld [smem:[#allocation13_spill]] }
  0x18   : > { %s239_s19 = scalar_lea.vmem [#allocation2], %s681_s14  ;;  %p1050_p0 = pnand %p724_p13, %p1017_p4 }
  0x19   : > { %s250_s20 = sshll.u32 %s239_s19, 4  ;;  %p687_p1 = scmp.ge.s32.totalorder %s934_s26, 1  ;;  %s251_s20 = int_to_ptr.vmem [resolvable:$true] %s250_s20 }
  0x1a   : > { %p279_p2 = scmp.lt.s32.totalorder %s934_s26, 3  ;;  %s236_s30 = scalar_lea.sflag [#allocation3], %s1041_s13 }
  0x1b   : > { %s684_s8 = sshll.u32 %s1041_s13, 6  ;;  %s705_s14 = sshll.u32 %s930_s25, 6 }
  0x1c   : > { %p280_p3 = pnand %p687_p1, %p279_p2  ;;  %s268_s17 = scalar_lea.hbm %s1157_s5, %s705_s14 }
  0x1d   : > { %s246_s18 = scalar_lea.hbm %s1167_s4, %s704_s15  ;;  %s269_s19 = sshll.u32 %s268_s17, 4  ;;  %s270_s19 = int_to_ptr.hbm [resolvable:$true] %s269_s19 }
  0x1e   : > { %s248_s27 = sshll.u32 %s246_s18, 4  ;;  %s261_s18 = scalar_lea.vmem [#allocation5], %s684_s8  ;;  %s249_s27 = int_to_ptr.hbm [resolvable:$true] %s248_s27 }
  0x1f   : > { %716 = dma.hbm_to_vmem [thread:$0]  (!%p1050_p0), %s249_s27, 256, %s251_s20, %s236_s30  }
  0x20   : > { %s271_s7 = sshll.u32 %s261_s18, 4  ;;  %s258_s4 = scalar_lea.sflag [#allocation6], %s1041_s13  ;;  %s272_s7 = int_to_ptr.vmem [resolvable:$true] %s271_s7 }
  0x21   : > { %s936_s29 = smov 256   ;;  %s937_s11 = smov 16  }
  0x22   : > { %719 = dma.hbm_to_vmem [thread:$0]  (!%p1050_p0), %s270_s19, 1024, %s272_s7, %s258_s4, %s936_s29, %s936_s29, %s937_s11  }
  0x23   : > { %283 = sbr.rel (%p280_p3) target bundleno = 360 (0x168), region = 44  ;;  %s1068_s20 = sand.u32 (!%p280_p3), 1, %s918_s22  }
  0x24   : > { %s688_s27 = sshll.u32 (!%p280_p3), %s1068_s20, 4  ;;  %s286_s30 = scalar_lea.sflag (!%p280_p3), [#allocation3], %s1068_s20 }
  0x25   : > { %s289_s14 = scalar_lea.vmem (!%p280_p3), [#allocation2], %s688_s27 }
  0x28   : > { %901 = dma.done.wait (%p1023_p8), %s286_s30, 256  }
  0x29   : > { %903 = vsyncadd (%p1023_p8), %s286_s30, 4294967040  ;;  %s689_s4 = sshll.u32 %s1068_s20, 6  ;;  %s296_s29 = scalar_lea.sflag [#allocation6], %s1068_s20 }
  0x2a   : > { %s1080_s11 = scalar_lea.vmem [#allocation5], %s689_s4 }
  0x2b   : > { %905 = dma.done.wait (%p1023_p8), %s296_s29, 1024  }
  0x2c   : > { %907 = vsyncadd (%p1023_p8), %s296_s29, 4294966272  ;;  %v938_v0 = vmov 0   ;;  %vm346_vm0 = vcmask 64512   ;;  %v337_v1 = vld [vmem:[%s289_s14] sm:$0xff]  ;;  %v338_v2 = vld [vmem:[%s289_s14 + $0x8] sm:$0xff]  ;;  %vm407_vm1 = vcmask 1043456  }
  0x2d   : > { %779 = vset.pattern.permute.xlu0 %v938_v0  ;;  %v339_v3 = vld [vmem:[%s1152_s0] sm:$0xf]  ;;  %365 = vmatpush.msra.mxu0 %v337_v1  ;;  %vm403_vm4 = vcmask 31744   ;;  %vm503_vm11 = vcmask 1040384   ;;  %vm505_vm13 = vcmask 1041409   ;;  %vm508_vm14 = vcmask 1042434  }
  0x2e   : > { %385 = vmatpush.msra.mxu1 %v338_v2  ;;  %v340_v4 = vld [vmem:[%s1153_s1] sm:$0xf]  ;;  %691 = vmatmul.msk.f32.vlgmr.msra.gmra.mxu0 %vm346_vm0, %v339_v3  ;;  %vm511_vm15 = vcmask 1043459   ;;  %s706_s7 = sshll.u32 %s926_s24, 6  ;;  %v493_v54 = vld [vmem:[%s1080_s11 + $0x8] sm:$0xff]  ;;  %v494_v59 = vld [vmem:[%s1080_s11 + $0x10] sm:$0xff] }
  0x2f   : > { %692 = vmatmul.msk.f32.vlgmr.msra.gmra.mxu1 %vm346_vm0, %v339_v3  ;;  %343 = vperm.xlu0 %779, %v340_v4   ;;  %v397_v5 = vld [vmem:[%s1155_s3] sm:$0xf]  ;;  %v495_v60 = vld [vmem:[%s1080_s11 + $0x18] sm:$0xff]  ;;  %v497_v3 = vld [vmem:[%s1080_s11 + $0x28] sm:$0xff]  ;;  %s560_s27 = scalar_lea.hbm %s1158_s6, %s706_s7  ;;  %s333_s30 = scalar_lea.vmem [#allocation7], %s689_s4 }
  0x30   : > { %v396_v13 = vld [vmem:[%s1154_s2] sm:$0xf]  ;;  %s561_s14 = sshll.u32 %s333_s30, 4  ;;  %s563_s29 = sshll.u32 %s560_s27, 4  ;;  %s562_s14 = int_to_ptr.vmem [resolvable:$true] %s561_s14  ;;  %s564_s29 = int_to_ptr.hbm [resolvable:$true] %s563_s29 }
  0x31   : > { %v492_v53 = vld [vmem:[%s1080_s11] sm:$0xff]  ;;  %s862_s13 = sshra.s32 %s564_s29, 4  ;;  %s868_s15 = scalar_lea.hbm %s1158_s6, 128  ;;  %s863_s13 = int_to_ptr.hbm [resolvable:$true] %s862_s13 }
  0x32   : > { %v496_v62 = vld [vmem:[%s1080_s11 + $0x20] sm:$0xff]  ;;  %s864_s4 = scalar_lea.hbm %s863_s13, 64  ;;  %p869_p7 = scmp.lt.s32.totalorder %s863_s13, %s1158_s6 }
  0x33   : > { %p865_p4 = scmp.ne.s32.totalorder %s863_s13, %s864_s4  ;;  %p870_p8 = scmp.lt.s32.totalorder %s868_s15, %s864_s4 }
  0x35   : > { %p866_p5 = pnand %p865_p4, %p1027_p9  ;;  %p871_p10 = por %p870_p8, %p869_p7 }
  0x37   : > { %400 = vperm.xlu0 %779, %v397_v5   ;;  %p867_p6 = pneg %p866_p5 }
  0x39   : > { %p872_p13 = pnand %p871_p10, %p867_p6 }
  0xa1   : > { %v344_v6 = vpop.permute.xlu0 %343 }
  0xa9   : > { %v401_v16 = vpop.permute.xlu0 %400 }
  0xab   : > { %v367_v7 = vpop.f32.mrf.mxu0 }
  0xac   : > { %v387_v8 = vpop.f32.mrf.mxu1  ;;  %v368_v9 = vadd.f32 %v367_v7, %v344_v6  ;;  %v498_v7 = vld [vmem:[%s1080_s11 + $0x30] sm:$0xff] }
  0xad   : > { %v388_v10 = vadd.f32 %v387_v8, %v344_v6 }
  0xae   : > { %vm390_vm2 = vcmp.gt.f32.partialorder %v368_v9, 0.0  ;;  %v392_v11 = vmul.f32 0.01, %v368_v9 }
  0xaf   : > { %vm391_vm3 = vcmp.gt.f32.partialorder %v388_v10, 0.0  ;;  %v393_v12 = vmul.f32 0.01, %v388_v10 }
  0xb0   : > { %v394_v14 = vsel %vm390_vm2, %v368_v9, %v392_v11  ;;  %v499_v11 = vld [vmem:[%s1080_s11 + $0x38] sm:$0xff]  ;;  %s547_s11 = scalar_lea.sflag [#allocation4], %s1068_s20 }
  0xb1   : > { %v395_v15 = vsel %vm391_vm3, %v388_v10, %v393_v12  ;;  %693 = vmatpush.msk.msra.mxu2 %vm407_vm1, %v394_v14 }
  0xb2   : > { %695 = vmatpush.msk.msra.mxu3 %vm407_vm1, %v395_v15  ;;  %694 = vmatmul.msk.f32.vlgmr.msra.gmra.mxu2 %vm403_vm4, %v396_v13 }
  0xb3   : > { %696 = vmatmul.msk.f32.vlgmr.msra.gmra.mxu3 %vm403_vm4, %v396_v13 }
 0x135   : > { %v431_v17 = vpop.f32.mrf.mxu2 }
 0x136   : > { %v451_v18 = vpop.f32.mrf.mxu3  ;;  %v432_v19 = vadd.f32 %v431_v17, %v401_v16 }
 0x137   : > { %v452_v20 = vadd.f32 %v451_v18, %v401_v16 }
 0x138   : > { %v697_v21 = vmul.f32 -1.442695, %v432_v19 }
 0x139   : > { %v698_v22 = vmul.f32 -1.442695, %v452_v20 }
 0x13a   : > { %780 = vpow2.f32 %v697_v21 }
 0x13b   : > { %782 = vpow2.f32 %v698_v22 }
 0x140   : > { %v781_v23 = vpop.eup %780 }
 0x141   : > { %v783_v24 = vpop.eup %782  ;;  %v460_v25 = vadd.f32 1.0, %v781_v23 }
 0x142   : > { %v461_v26 = vadd.f32 1.0, %v783_v24 }
 0x143   : > { %784 = vrcp.f32 %v460_v25  ;;  %vm467_vm7 = vweird.f32 %v460_v25  ;;  %v473_v38 = vand.u32 2147483648, %v460_v25  ;;  %v471_v40 = vand.u32 2147483647, %v460_v25 }
 0x144   : > { %786 = vrcp.f32 %v461_v26  ;;  %v488_v34 = vand.u32 2147483648, %v461_v26  ;;  %v486_v36 = vand.u32 2147483647, %v461_v26  ;;  %vm482_vm9 = vweird.f32 %v461_v26 }
 0x145   : > { %v474_v45 = vor.u32 1.1754944e-38, %v473_v38  ;;  %vm472_vm0 = vcmp.eq.f32.partialorder %v471_v40, 8.507059e+37 }
 0x146   : > { %v489_v42 = vor.u32 1.1754944e-38, %v488_v34  ;;  %vm487_vm12 = vcmp.eq.f32.partialorder %v486_v36, 8.507059e+37 }
 0x149   : > { %v785_v27 = vpop.eup %784 }
 0x14a   : > { %v787_v28 = vpop.eup %786  ;;  %v463_v29 = vmul.f32 %v785_v27, %v460_v25  ;;  %vm468_vm5 = vweird.f32 %v785_v27 }
 0x14b   : > { %v478_v30 = vmul.f32 %v787_v28, %v461_v26  ;;  %vm483_vm6 = vweird.f32 %v787_v28  ;;  %vm1098_vm8 = vmor %vm467_vm7, %vm468_vm5 }
 0x14c   : > { %v464_v31 = vsub.f32 1.0, %v463_v29  ;;  %vm484_vm10 = vmor %vm482_vm9, %vm483_vm6 }
 0x14d   : > { %v479_v32 = vsub.f32 1.0, %v478_v30 }
 0x14e   : > { %v465_v33 = vmul.f32 %v785_v27, %v464_v31 }
 0x14f   : > { %v480_v35 = vmul.f32 %v787_v28, %v479_v32 }
 0x150   : > { %v466_v37 = vadd.f32 %v785_v27, %v465_v33 }
 0x151   : > { %v481_v41 = vadd.f32 %v787_v28, %v480_v35 }
 0x152   : > { %v470_v43 = vsel %vm1098_vm8, %v785_v27, %v466_v37 }
 0x153   : > { %v485_v44 = vsel %vm484_vm10, %v787_v28, %v481_v41  ;;  %v475_v48 = vsel %vm472_vm0, %v474_v45, %v470_v43 }
 0x154   : > { %v490_v46 = vsel %vm487_vm12, %v489_v42, %v485_v44 }
 0x155   : > { %v502_v47 = vrot.slane %v490_v46, 7 }
 0x157   : > { %v504_v49 = vsel %vm503_vm11, %v475_v48, %v502_v47  ;;  %v506_v50 = vsel %vm505_vm13, %v475_v48, %v502_v47  ;;  %v509_v51 = vsel %vm508_vm14, %v475_v48, %v502_v47  ;;  %v512_v52 = vsel %vm511_vm15, %v475_v48, %v502_v47 }
 0x158   : > { %v507_v55 = vrot.slane %v506_v50, 1  ;;  %v510_v56 = vrot.slane %v509_v51, 2  ;;  %v513_v57 = vrot.slane %v512_v52, 3  ;;  %v514_v58 = vperm.slane %v504_v49, 0 }
 0x159   : > { %v515_v61 = vperm.slane %v504_v49, 1 }
 0x15a   : > { %v516_v63 = vperm.slane %v507_v55, 0  ;;  %v517_v0 = vperm.slane %v507_v55, 1  ;;  %v518_v1 = vperm.slane %v510_v56, 0  ;;  %v519_v2 = vperm.slane %v510_v56, 1 }
 0x15b   : > { %v520_v4 = vperm.slane %v513_v57, 0  ;;  %v530_v5 = vmul.f32 %v514_v58, %v492_v53  ;;  %v531_v6 = vmul.f32 %v515_v61, %v493_v54  ;;  %v521_v8 = vperm.slane %v513_v57, 1 }
 0x15c   : > { %v532_v9 = vmul.f32 %v516_v63, %v494_v59  ;;  %v533_v10 = vmul.f32 %v517_v0, %v495_v60  ;;  %v534_v12 = vmul.f32 %v518_v1, %v496_v62  ;;  %v535_v13 = vmul.f32 %v519_v2, %v497_v3 }
 0x15d   : > { %538 = vst [vmem:[%s333_s30] sm:$0xff] %v530_v5  ;;  %v536_v14 = vmul.f32 %v520_v4, %v498_v7  ;;  %v537_v15 = vmul.f32 %v521_v8, %v499_v11 }
 0x15e   : > { %539 = vst [vmem:[%s333_s30 + $0x8] sm:$0xff] %v531_v6 }
 0x15f   : > { %540 = vst [vmem:[%s333_s30 + $0x10] sm:$0xff] %v532_v9 }
 0x160   : > { %541 = vst [vmem:[%s333_s30 + $0x18] sm:$0xff] %v533_v10 }
 0x161   : > { %542 = vst [vmem:[%s333_s30 + $0x20] sm:$0xff] %v534_v12 }
 0x162   : > { %543 = vst [vmem:[%s333_s30 + $0x28] sm:$0xff] %v535_v13 }
 0x163   : > { %544 = vst [vmem:[%s333_s30 + $0x30] sm:$0xff] %v536_v14 }
 0x164   : > { %545 = vst [vmem:[%s333_s30 + $0x38] sm:$0xff] %v537_v15 }
 0x165   : > { %875 = shalt.err (!%p872_p13)
}
 0x166   : > { %s939_s20 = smov 256   ;;  %s940_s17 = smov 16  }
 0x167   : > { %711 = dma.vmem_to_hbm [thread:$0]  (%p1027_p9), %s562_s14, 1024, %s564_s29, %s547_s11, %s939_s20, %s939_s20, %s940_s17  }
 0x168 PF: > { %s578_s18 = sand.u32 1, %s914_s21   ;;  %p721_p0 = pnand %p680_p12, %p1034_p11 }
 0x169   : > { %s579_s7 = scalar_lea.sflag [#allocation4], %s578_s18 }
 0x16a   : > { %p722_p1 = pneg %p721_p0 }
 0x16c   : > { %909 = dma.done.wait (%p722_p1), %s579_s7, 1024  }
 0x16d   : > { %911 = vsyncadd (%p722_p1), %s579_s7, 4294966272  ;;  %s25_s26 = sadd.s32 1, %s934_s26   ;;  %s1171_s24 = sld [smem:[#allocation12_spill]] }
 0x16e   : > { %p22_p2 = scmp.ge.s32.totalorder %s25_s26, 4   ;;  %s1172_s10 = sld [smem:[#allocation11_spill]] }
 0x16f   : > { %s1173_s21 = smov %s918_s22  ;;  %s1174_s22 = smov %s922_s23 }
 0x170   :  { %24 = sbr.rel (!%p22_p2) target bundleno = 10 (0xa), region = 102 }
 0x173   : > { %s1175_s23 = smov %s1171_s24  ;;  %s1176_s24 = smov %s930_s25 }
 0x174   : > { %s1177_s25 = smov %s1172_s10 }
 0x175   :  { %585 = vsyncpa [#allocation3], 1 }
 0x176   :  { %587 = vsyncpa [#allocation3 + $0x1], 1 }
 0x177   :  { %588 = vsyncpa [#allocation6], 1 }
 0x178   :  { %590 = vsyncpa [#allocation6 + $0x1], 1 }
 0x179   :  { %591 = vsyncpa [#allocation4], 1 }
 0x17a   :  { %593 = vsyncpa [#allocation4 + $0x1], 1 }

</bundles_post_ra>
